<compile_context>
chip_gen: v7x
topology: tpu7x:2x2x1
jax: 0.10.0
libtpu: 0.0.40
codegen_flags: <defaults>
</compile_context>

<pallas_src>
import functools

import jax
import jax.numpy as jnp
from jax.experimental import pallas as pl
from jax.experimental.pallas import tpu as pltpu

EPS = 1e-5
HIDDEN = 40
# Packed-parameter slab column indices (slab shape (HIDDEN, 8)). b1 is not packed: it cancels
# exactly inside batch-stats BatchNorm.
_W1, _G1, _BE1, _B2, _G2, _BE2, _W3, _B3 = range(8)


def _round_up(a, b):
    return (a + b - 1) // b * b


def _regression_kernel(x_ref, p_ref, w2t_ref, o_ref,
                       xsum, xsq, fsum, fsq, *, n_valid, tile_n):
    """Grid = (3 phases, batch tiles). Batch rides the 128-lane axis."""
    phase = pl.program_id(0)
    tile = pl.program_id(1)
    inv_n = 1.0 / float(n_valid)

    @pl.when((phase == 0) & (tile == 0))
    def _init():
        xsum[...] = jnp.zeros_like(xsum)
        xsq[...] = jnp.zeros_like(xsq)
        fsum[...] = jnp.zeros_like(fsum)
        fsq[...] = jnp.zeros_like(fsq)

    @pl.when(phase == 0)
    def _x_stats():
        xs = x_ref[...]                                        # (1, T); padded cols are 0
        xsum[...] += jnp.sum(xs, axis=-1, keepdims=True)       # (1, 1)
        xsq[...] += jnp.sum(xs * xs, axis=-1, keepdims=True)   # (1, 1)

    def _h2_tile():
        # BN1 folded analytically:
        #   BN1(h1) = g1 * w1 * (x - mu_x) * rsqrt(var_x * w1^2 + eps) + be1   (b1 cancels)
        mu_x = xsum[...] * inv_n                               # (1, 1)
        var_x = xsq[...] * inv_n - mu_x * mu_x                 # (1, 1), biased
        w1 = p_ref[:, _W1:_W1 + 1]                             # (40, 1) ref slices (no slab copy)
        g1 = p_ref[:, _G1:_G1 + 1]
        be1 = p_ref[:, _BE1:_BE1 + 1]
        a1 = w1 * g1 * jax.lax.rsqrt(var_x * (w1 * w1) + EPS)  # (40, 1)
        xs = x_ref[...]                                        # (1, T)
        h = jnp.maximum(a1 * (xs - mu_x) + be1, 0.0)           # (40, T) = ReLU(BN1(h1))^T
        # Linear(40,40): the only MXU op; bf16 operands, f32 accumulation.
        h2 = jnp.dot(w2t_ref[...].astype(jnp.bfloat16), h.astype(jnp.bfloat16),
                     preferred_element_type=jnp.float32)       # (40, T)
        return h2 + p_ref[:, _B2:_B2 + 1]

    @pl.when(phase == 1)
    def _h2_stats():
        h2 = _h2_tile()
        # Mask padded batch columns so BN2 stats use exactly N samples (full-batch divisor).
        col = jax.lax.broadcasted_iota(jnp.int32, (1, tile_n), 1) + tile * tile_n
        mask = (col < n_valid).astype(jnp.float32)             # (1, T)
        hm = h2 * mask
        fsum[...] += jnp.sum(hm, axis=-1, keepdims=True)       # (40, 1)
        fsq[...] += jnp.sum(hm * hm, axis=-1, keepdims=True)   # (40, 1)

    @pl.when(phase == 2)
    def _apply():
        h2 = _h2_tile()
        mu2 = fsum[...] * inv_n                                # (40, 1)
        var2 = fsq[...] * inv_n - mu2 * mu2                    # biased variance
        g2 = p_ref[:, _G2:_G2 + 1]
        be2 = p_ref[:, _BE2:_BE2 + 1]
        s2 = g2 * jax.lax.rsqrt(var2 + EPS)                    # (40, 1)
        h = jnp.maximum(s2 * (h2 - mu2) + be2, 0.0)            # (40, T)
        # Linear(40,1): elementwise multiply + sublane reduction (no second MXU pass).
        w3 = p_ref[:, _W3:_W3 + 1]                             # (40, 1)
        b3 = p_ref[0:1, _B3:_B3 + 1]                           # (1, 1)
        o_ref[...] = jnp.sum(h * w3, axis=0, keepdims=True) + b3   # (1, T) lane-dense store


def pack_params(params):
    """Pack per-feature params into one (40, 8) column slab + transposed w2. Call once."""
    cols = [
        params["w1"].reshape(HIDDEN, 1),
        params["g1"].reshape(HIDDEN, 1),
        params["be1"].reshape(HIDDEN, 1),
        params["b2"].reshape(HIDDEN, 1),
        params["g2"].reshape(HIDDEN, 1),
        params["be2"].reshape(HIDDEN, 1),
        params["w3"].reshape(HIDDEN, 1),
        jnp.broadcast_to(params["b3"].reshape(1, 1), (HIDDEN, 1)),
    ]
    slab = jnp.concatenate(cols, axis=1).astype(jnp.float32)   # (40, 8)
    w2t = params["w2"].T.astype(jnp.float32)                   # (40_out, 40_in) for w2^T @ h^T
    return slab, w2t


def regression_forward(x, slab, w2t, *, max_tile_n=4096):
    """x: (N, 1) float32 -> (N, 1) float32."""
    N = x.shape[0]
    tile_n = min(max_tile_n, _round_up(N, 128))    # lane-dense batch tile (multiple of 128)
    n_pad = _round_up(N, tile_n)
    num_tiles = n_pad // tile_n

    # Layout plumbing: batch on the 128-lane axis, zero-padded to whole tiles.
    x_row = jnp.pad(x.reshape(N).astype(jnp.float32), (0, n_pad - N)).reshape(1, n_pad)

    kernel = functools.partial(_regression_kernel, n_valid=N, tile_n=tile_n)

    out_row = pl.pallas_call(
        kernel,
        out_shape=jax.ShapeDtypeStruct((1, n_pad), jnp.float32),
        grid_spec=pltpu.PrefetchScalarGridSpec(
            num_scalar_prefetch=0,
            grid=(3, num_tiles),
            in_specs=[
                pl.BlockSpec((1, tile_n), lambda p, t: (0, t)),        # x row tile
                pl.BlockSpec((HIDDEN, 8), lambda p, t: (0, 0)),        # param slab (resident)
                pl.BlockSpec((HIDDEN, HIDDEN), lambda p, t: (0, 0)),   # w2^T (resident)
            ],
            out_specs=pl.BlockSpec((1, tile_n), lambda p, t: (0, t)),
            scratch_shapes=[
                pltpu.VMEM((1, 1), jnp.float32),        # sum(x)
                pltpu.VMEM((1, 1), jnp.float32),        # sum(x^2)
                pltpu.VMEM((HIDDEN, 1), jnp.float32),   # per-feature sum(h2)
                pltpu.VMEM((HIDDEN, 1), jnp.float32),   # per-feature sum(h2^2)
            ],
        ),
        # BN2 stats scratch is shared across batch tiles -> keep both axes "arbitrary".
        # TODO(synk): on v7x, per-core partial BN2 stats + a cross-core combine would let the
        # tile axis run "parallel" across the 2 TensorCores.
        compiler_params=pltpu.CompilerParams(
            dimension_semantics=("arbitrary", "arbitrary")),
    )(x_row, slab, w2t)

    return out_row[0, :N].reshape(N, 1)


def init_params(key):
    """Deterministic parameter init (PyTorch-Linear-style uniform fan-in bounds)."""
    k1, k2, k3, k4, k5, k6 = jax.random.split(key, 6)

    def linear_init(kw, kb, fan_in, fan_out):
        bound = 1.0 / jnp.sqrt(float(fan_in))
        w = jax.random.uniform(kw, (fan_in, fan_out), jnp.float32, -bound, bound)
        b = jax.random.uniform(kb, (1, fan_out), jnp.float32, -bound, bound)
        return w, b

    w1, b1 = linear_init(k1, k2, 1, HIDDEN)
    w2, b2 = linear_init(k3, k4, HIDDEN, HIDDEN)
    w3, b3 = linear_init(k5, k6, HIDDEN, 1)

    return {
        "w1": w1, "b1": b1,
        "g1": jnp.ones((1, HIDDEN), jnp.float32), "be1": jnp.zeros((1, HIDDEN), jnp.float32),
        "w2": w2, "b2": b2,
        "g2": jnp.ones((1, HIDDEN), jnp.float32), "be2": jnp.zeros((1, HIDDEN), jnp.float32),
        "w3": w3, "b3": b3,
    }


def _reference_forward(x, p):
    """Pure-JAX f32 reference matching the PyTorch module (training-mode BatchNorm)."""
    h = x @ p["w1"] + p["b1"]
    m = h.mean(0, keepdims=True)
    v = ((h - m) ** 2).mean(0, keepdims=True)
    h = (h - m) / jnp.sqrt(v + EPS) * p["g1"] + p["be1"]
    h = jnp.maximum(h, 0.0)
    h = h @ p["w2"] + p["b2"]
    m = h.mean(0, keepdims=True)
    v = ((h - m) ** 2).mean(0, keepdims=True)
    h = (h - m) / jnp.sqrt(v + EPS) * p["g2"] + p["be2"]
    h = jnp.maximum(h, 0.0)
    return h @ p["w3"] + p["b3"]


if __name__ == "__main__":
    key = jax.random.PRNGKey(0)
    kp, kx = jax.random.split(key)
    params = init_params(kp)
    slab, w2t = pack_params(params)            # packed once, outside the per-call path

    N = 8  # small batch
    x = jax.random.normal(kx, (N, 1), jnp.float32)

    fwd = jax.jit(regression_forward)
    out = jax.block_until_ready(fwd(x, slab, w2t))

    ref = _reference_forward(x, params)
    assert out.shape == (N, 1)
    # bf16 MXU operands (f32 accumulation) -> loosened tolerance vs the pure-f32 reference.
    assert jnp.allclose(out, ref, atol=5e-2, rtol=5e-2), "mismatch vs reference"

    print("KERNEL_OK")
</pallas_src>

<mosaic_0001>
module attributes {stable_mosaic.version = 11 : i64} {
  func.func @_regression_kernel(%arg0: i32, %arg1: i32, %arg2: memref<1x128xf32, #tpu.memory_space<vmem>>, %arg3: memref<40x8xf32, #tpu.memory_space<vmem>>, %arg4: memref<40x40xf32, #tpu.memory_space<vmem>>, %arg5: memref<1x128xf32, #tpu.memory_space<vmem>>, %arg6: memref<1x1xf32, #tpu.memory_space<vmem>>, %arg7: memref<1x1xf32, #tpu.memory_space<vmem>>, %arg8: memref<40x1xf32, #tpu.memory_space<vmem>>, %arg9: memref<40x1xf32, #tpu.memory_space<vmem>>) attributes {dimension_semantics = [#tpu.dimension_semantics<arbitrary>, #tpu.dimension_semantics<arbitrary>], iteration_bounds = array<i64: 3, 1>, scalar_prefetch = 0 : i64, scratch_operands = 4 : i64, tpu.core_type = #tpu.core_type<tc>, window_params = [{transform_indices = @transform_0, window_bounds = array<i64: 1, 128>}, {pipeline_mode = #tpu.pipeline_mode<synchronous>, transform_indices = @transform_1, window_bounds = array<i64: 40, 8>}, {pipeline_mode = #tpu.pipeline_mode<synchronous>, transform_indices = @transform_2, window_bounds = array<i64: 40, 40>}, {transform_indices = @transform_3, window_bounds = array<i64: 1, 128>}]} {
    %c0_i32 = arith.constant 0 : i32
    %0 = arith.cmpi eq, %arg0, %c0_i32 : i32
    %c0_i32_0 = arith.constant 0 : i32
    %1 = arith.cmpi eq, %arg1, %c0_i32_0 : i32
    %2 = arith.andi %0, %1 : i1
    %3 = arith.extui %2 : i1 to i32
    %c0_i32_1 = arith.constant 0 : i32
    %4 = arith.cmpi ne, %3, %c0_i32_1 : i32
    scf.if %4 {
      %cst = arith.constant 0.000000e+00 : f32
      %14 = vector.broadcast %cst : f32 to vector<1x1xf32>
      %c0 = arith.constant 0 : index
      %c0_6 = arith.constant 0 : index
      %15 = vector.load %arg6[%c0, %c0_6] : memref<1x1xf32, #tpu.memory_space<vmem>>, vector<1x1xf32>
      tpu.vector_store %arg6[%c0, %c0_6], %14 {strides = array<i32>} : memref<1x1xf32, #tpu.memory_space<vmem>>, vector<1x1xf32>,
      %cst_7 = arith.constant 0.000000e+00 : f32
      %16 = vector.broadcast %cst_7 : f32 to vector<1x1xf32>
      %c0_8 = arith.constant 0 : index
      %c0_9 = arith.constant 0 : index
      %17 = vector.load %arg7[%c0_8, %c0_9] : memref<1x1xf32, #tpu.memory_space<vmem>>, vector<1x1xf32>
      tpu.vector_store %arg7[%c0_8, %c0_9], %16 {strides = array<i32>} : memref<1x1xf32, #tpu.memory_space<vmem>>, vector<1x1xf32>,
      %cst_10 = arith.constant 0.000000e+00 : f32
      %18 = vector.broadcast %cst_10 : f32 to vector<40x1xf32>
      %c0_11 = arith.constant 0 : index
      %c0_12 = arith.constant 0 : index
      %19 = vector.load %arg8[%c0_11, %c0_12] : memref<40x1xf32, #tpu.memory_space<vmem>>, vector<40x1xf32>
      tpu.vector_store %arg8[%c0_11, %c0_12], %18 {strides = array<i32>} : memref<40x1xf32, #tpu.memory_space<vmem>>, vector<40x1xf32>,
      %cst_13 = arith.constant 0.000000e+00 : f32
      %20 = vector.broadcast %cst_13 : f32 to vector<40x1xf32>
      %c0_14 = arith.constant 0 : index
      %c0_15 = arith.constant 0 : index
      %21 = vector.load %arg9[%c0_14, %c0_15] : memref<40x1xf32, #tpu.memory_space<vmem>>, vector<40x1xf32>
      tpu.vector_store %arg9[%c0_14, %c0_15], %20 {strides = array<i32>} : memref<40x1xf32, #tpu.memory_space<vmem>>, vector<40x1xf32>,
    } else {
    }
    %c0_i32_2 = arith.constant 0 : i32
    %5 = arith.cmpi eq, %arg0, %c0_i32_2 : i32
    %6 = arith.extui %5 : i1 to i32
    %c0_i32_3 = arith.constant 0 : i32
    %7 = arith.cmpi ne, %6, %c0_i32_3 : i32
    scf.if %7 {
      %c0 = arith.constant 0 : index
      %c0_6 = arith.constant 0 : index
      %14 = vector.load %arg2[%c0, %c0_6] : memref<1x128xf32, #tpu.memory_space<vmem>>, vector<1x128xf32>
      %c0_7 = arith.constant 0 : index
      %c0_8 = arith.constant 0 : index
      %15 = vector.load %arg6[%c0_7, %c0_8] : memref<1x1xf32, #tpu.memory_space<vmem>>, vector<1x1xf32>
      %cst = arith.constant dense<0.000000e+00> : vector<1xf32>
      %16 = vector.multi_reduction <add>, %14, %cst [1] : vector<1x128xf32> to vector<1xf32>
      %17 = vector.shape_cast %16 : vector<1xf32> to vector<1x1xf32>
      %18 = arith.addf %15, %17 : vector<1x1xf32>
      %c0_9 = arith.constant 0 : index
      %c0_10 = arith.constant 0 : index
      %19 = vector.load %arg6[%c0_9, %c0_10] : memref<1x1xf32, #tpu.memory_space<vmem>>, vector<1x1xf32>
      tpu.vector_store %arg6[%c0_9, %c0_10], %18 {strides = array<i32>} : memref<1x1xf32, #tpu.memory_space<vmem>>, vector<1x1xf32>,
      %c0_11 = arith.constant 0 : index
      %c0_12 = arith.constant 0 : index
      %20 = vector.load %arg7[%c0_11, %c0_12] : memref<1x1xf32, #tpu.memory_space<vmem>>, vector<1x1xf32>
      %21 = arith.mulf %14, %14 : vector<1x128xf32>
      %cst_13 = arith.constant dense<0.000000e+00> : vector<1xf32>
      %22 = vector.multi_reduction <add>, %21, %cst_13 [1] : vector<1x128xf32> to vector<1xf32>
      %23 = vector.shape_cast %22 : vector<1xf32> to vector<1x1xf32>
      %24 = arith.addf %20, %23 : vector<1x1xf32>
      %c0_14 = arith.constant 0 : index
      %c0_15 = arith.constant 0 : index
      %25 = vector.load %arg7[%c0_14, %c0_15] : memref<1x1xf32, #tpu.memory_space<vmem>>, vector<1x1xf32>
      tpu.vector_store %arg7[%c0_14, %c0_15], %24 {strides = array<i32>} : memref<1x1xf32, #tpu.memory_space<vmem>>, vector<1x1xf32>,
    } else {
    }
    %c1_i32 = arith.constant 1 : i32
    %8 = arith.cmpi eq, %arg0, %c1_i32 : i32
    %9 = arith.extui %8 : i1 to i32
    %c0_i32_4 = arith.constant 0 : i32
    %10 = arith.cmpi ne, %9, %c0_i32_4 : i32
    scf.if %10 {
      %c0 = arith.constant 0 : index
      %c0_6 = arith.constant 0 : index
      %14 = vector.load %arg6[%c0, %c0_6] : memref<1x1xf32, #tpu.memory_space<vmem>>, vector<1x1xf32>
      %cst = arith.constant 1.250000e-01 : f32
      %15 = vector.broadcast %cst : f32 to vector<1x1xf32>
      %16 = arith.mulf %14, %15 : vector<1x1xf32>
      %c0_7 = arith.constant 0 : index
      %c0_8 = arith.constant 0 : index
      %17 = vector.load %arg7[%c0_7, %c0_8] : memref<1x1xf32, #tpu.memory_space<vmem>>, vector<1x1xf32>
      %cst_9 = arith.constant 1.250000e-01 : f32
      %18 = vector.broadcast %cst_9 : f32 to vector<1x1xf32>
      %19 = arith.mulf %17, %18 : vector<1x1xf32>
      %20 = arith.mulf %16, %16 : vector<1x1xf32>
      %21 = arith.subf %19, %20 : vector<1x1xf32>
      %c0_10 = arith.constant 0 : index
      %c0_11 = arith.constant 0 : index
      %22 = vector.load %arg3[%c0_10, %c0_11] : memref<40x8xf32, #tpu.memory_space<vmem>>, vector<40x1xf32>
      %c0_12 = arith.constant 0 : index
      %c1 = arith.constant 1 : index
      %23 = vector.load %arg3[%c0_12, %c1] : memref<40x8xf32, #tpu.memory_space<vmem>>, vector<40x1xf32>
      %c0_13 = arith.constant 0 : index
      %c2 = arith.constant 2 : index
      %24 = vector.load %arg3[%c0_13, %c2] : memref<40x8xf32, #tpu.memory_space<vmem>>, vector<40x1xf32>
      %25 = arith.mulf %22, %23 : vector<40x1xf32>
      %26 = arith.mulf %22, %22 : vector<40x1xf32>
      %27 = vector.broadcast %21 : vector<1x1xf32> to vector<40x1xf32>
      %28 = arith.mulf %27, %26 : vector<40x1xf32>
      %cst_14 = arith.constant 9.99999974E-6 : f32
      %29 = vector.broadcast %cst_14 : f32 to vector<40x1xf32>
      %30 = arith.addf %28, %29 : vector<40x1xf32>
      %31 = math.rsqrt %30 : vector<40x1xf32>
      %32 = arith.mulf %25, %31 : vector<40x1xf32>
      %c0_15 = arith.constant 0 : index
      %c0_16 = arith.constant 0 : index
      %33 = vector.load %arg2[%c0_15, %c0_16] : memref<1x128xf32, #tpu.memory_space<vmem>>, vector<1x128xf32>
      %34 = vector.broadcast %16 : vector<1x1xf32> to vector<1x128xf32>
      %35 = arith.subf %33, %34 : vector<1x128xf32>
      %36 = vector.broadcast %32 : vector<40x1xf32> to vector<40x128xf32>
      %37 = vector.broadcast %35 : vector<1x128xf32> to vector<40x128xf32>
      %38 = arith.mulf %36, %37 : vector<40x128xf32>
      %39 = vector.broadcast %24 : vector<40x1xf32> to vector<40x128xf32>
      %40 = arith.addf %38, %39 : vector<40x128xf32>
      %cst_17 = arith.constant 0.000000e+00 : f32
      %41 = vector.broadcast %cst_17 : f32 to vector<40x128xf32>
      %42 = arith.maximumf %40, %41 : vector<40x128xf32>
      %c0_18 = arith.constant 0 : index
      %c0_19 = arith.constant 0 : index
      %43 = vector.load %arg4[%c0_18, %c0_19] : memref<40x40xf32, #tpu.memory_space<vmem>>, vector<40x40xf32>
      %44 = arith.truncf %43 : vector<40x40xf32> to vector<40x40xbf16>
      %45 = arith.truncf %42 : vector<40x128xf32> to vector<40x128xbf16>
      %cst_20 = arith.constant dense<0.000000e+00> : vector<40x128xf32>
      %46 = tpu.matmul %44, %45, %cst_20 {dimension_numbers = #tpu.dot_dimension_numbers<[1], [0], [0], [1], [0, 0, 1, 1], [], []>} : vector<40x40xbf16>, vector<40x128xbf16>, vector<40x128xf32> -> vector<40x128xf32>
      %c0_21 = arith.constant 0 : index
      %c3 = arith.constant 3 : index
      %47 = vector.load %arg3[%c0_21, %c3] : memref<40x8xf32, #tpu.memory_space<vmem>>, vector<40x1xf32>
      %48 = vector.broadcast %47 : vector<40x1xf32> to vector<40x128xf32>
      %49 = arith.addf %46, %48 : vector<40x128xf32>
      %50 = tpu.iota {dimensions = array<i32: 1>} : vector<1x128xi32>
      %c128_i32 = arith.constant 128 : i32
      %51 = arith.muli %arg1, %c128_i32 : i32
      %52 = vector.broadcast %51 : i32 to vector<1x128xi32>
      %53 = arith.addi %50, %52 : vector<1x128xi32>
      %c8_i32 = arith.constant 8 : i32
      %54 = vector.broadcast %c8_i32 : i32 to vector<1x128xi32>
      %55 = arith.cmpi slt, %53, %54 : vector<1x128xi32>
      %56 = arith.extui %55 : vector<1x128xi1> to vector<1x128xi32>
      %57 = arith.sitofp %56 : vector<1x128xi32> to vector<1x128xf32>
      %58 = vector.broadcast %57 : vector<1x128xf32> to vector<40x128xf32>
      %59 = arith.mulf %49, %58 : vector<40x128xf32>
      %c0_22 = arith.constant 0 : index
      %c0_23 = arith.constant 0 : index
      %60 = vector.load %arg8[%c0_22, %c0_23] : memref<40x1xf32, #tpu.memory_space<vmem>>, vector<40x1xf32>
      %cst_24 = arith.constant dense<0.000000e+00> : vector<40xf32>
      %61 = vector.multi_reduction <add>, %59, %cst_24 [1] : vector<40x128xf32> to vector<40xf32>
      %62 = vector.shape_cast %61 : vector<40xf32> to vector<40x1xf32>
      %63 = arith.addf %60, %62 : vector<40x1xf32>
      %c0_25 = arith.constant 0 : index
      %c0_26 = arith.constant 0 : index
      %64 = vector.load %arg8[%c0_25, %c0_26] : memref<40x1xf32, #tpu.memory_space<vmem>>, vector<40x1xf32>
      tpu.vector_store %arg8[%c0_25, %c0_26], %63 {strides = array<i32>} : memref<40x1xf32, #tpu.memory_space<vmem>>, vector<40x1xf32>,
      %c0_27 = arith.constant 0 : index
      %c0_28 = arith.constant 0 : index
      %65 = vector.load %arg9[%c0_27, %c0_28] : memref<40x1xf32, #tpu.memory_space<vmem>>, vector<40x1xf32>
      %66 = arith.mulf %59, %59 : vector<40x128xf32>
      %cst_29 = arith.constant dense<0.000000e+00> : vector<40xf32>
      %67 = vector.multi_reduction <add>, %66, %cst_29 [1] : vector<40x128xf32> to vector<40xf32>
      %68 = vector.shape_cast %67 : vector<40xf32> to vector<40x1xf32>
      %69 = arith.addf %65, %68 : vector<40x1xf32>
      %c0_30 = arith.constant 0 : index
      %c0_31 = arith.constant 0 : index
      %70 = vector.load %arg9[%c0_30, %c0_31] : memref<40x1xf32, #tpu.memory_space<vmem>>, vector<40x1xf32>
      tpu.vector_store %arg9[%c0_30, %c0_31], %69 {strides = array<i32>} : memref<40x1xf32, #tpu.memory_space<vmem>>, vector<40x1xf32>,
    } else {
    }
    %c2_i32 = arith.constant 2 : i32
    %11 = arith.cmpi eq, %arg0, %c2_i32 : i32
    %12 = arith.extui %11 : i1 to i32
    %c0_i32_5 = arith.constant 0 : i32
    %13 = arith.cmpi ne, %12, %c0_i32_5 : i32
    scf.if %13 {
      %c0 = arith.constant 0 : index
      %c0_6 = arith.constant 0 : index
      %14 = vector.load %arg6[%c0, %c0_6] : memref<1x1xf32, #tpu.memory_space<vmem>>, vector<1x1xf32>
      %cst = arith.constant 1.250000e-01 : f32
      %15 = vector.broadcast %cst : f32 to vector<1x1xf32>
      %16 = arith.mulf %14, %15 : vector<1x1xf32>
      %c0_7 = arith.constant 0 : index
      %c0_8 = arith.constant 0 : index
      %17 = vector.load %arg7[%c0_7, %c0_8] : memref<1x1xf32, #tpu.memory_space<vmem>>, vector<1x1xf32>
      %cst_9 = arith.constant 1.250000e-01 : f32
      %18 = vector.broadcast %cst_9 : f32 to vector<1x1xf32>
      %19 = arith.mulf %17, %18 : vector<1x1xf32>
      %20 = arith.mulf %16, %16 : vector<1x1xf32>
      %21 = arith.subf %19, %20 : vector<1x1xf32>
      %c0_10 = arith.constant 0 : index
      %c0_11 = arith.constant 0 : index
      %22 = vector.load %arg3[%c0_10, %c0_11] : memref<40x8xf32, #tpu.memory_space<vmem>>, vector<40x1xf32>
      %c0_12 = arith.constant 0 : index
      %c1 = arith.constant 1 : index
      %23 = vector.load %arg3[%c0_12, %c1] : memref<40x8xf32, #tpu.memory_space<vmem>>, vector<40x1xf32>
      %c0_13 = arith.constant 0 : index
      %c2 = arith.constant 2 : index
      %24 = vector.load %arg3[%c0_13, %c2] : memref<40x8xf32, #tpu.memory_space<vmem>>, vector<40x1xf32>
      %25 = arith.mulf %22, %23 : vector<40x1xf32>
      %26 = arith.mulf %22, %22 : vector<40x1xf32>
      %27 = vector.broadcast %21 : vector<1x1xf32> to vector<40x1xf32>
      %28 = arith.mulf %27, %26 : vector<40x1xf32>
      %cst_14 = arith.constant 9.99999974E-6 : f32
      %29 = vector.broadcast %cst_14 : f32 to vector<40x1xf32>
      %30 = arith.addf %28, %29 : vector<40x1xf32>
      %31 = math.rsqrt %30 : vector<40x1xf32>
      %32 = arith.mulf %25, %31 : vector<40x1xf32>
      %c0_15 = arith.constant 0 : index
      %c0_16 = arith.constant 0 : index
      %33 = vector.load %arg2[%c0_15, %c0_16] : memref<1x128xf32, #tpu.memory_space<vmem>>, vector<1x128xf32>
      %34 = vector.broadcast %16 : vector<1x1xf32> to vector<1x128xf32>
      %35 = arith.subf %33, %34 : vector<1x128xf32>
      %36 = vector.broadcast %32 : vector<40x1xf32> to vector<40x128xf32>
      %37 = vector.broadcast %35 : vector<1x128xf32> to vector<40x128xf32>
      %38 = arith.mulf %36, %37 : vector<40x128xf32>
      %39 = vector.broadcast %24 : vector<40x1xf32> to vector<40x128xf32>
      %40 = arith.addf %38, %39 : vector<40x128xf32>
      %cst_17 = arith.constant 0.000000e+00 : f32
      %41 = vector.broadcast %cst_17 : f32 to vector<40x128xf32>
      %42 = arith.maximumf %40, %41 : vector<40x128xf32>
      %c0_18 = arith.constant 0 : index
      %c0_19 = arith.constant 0 : index
      %43 = vector.load %arg4[%c0_18, %c0_19] : memref<40x40xf32, #tpu.memory_space<vmem>>, vector<40x40xf32>
      %44 = arith.truncf %43 : vector<40x40xf32> to vector<40x40xbf16>
      %45 = arith.truncf %42 : vector<40x128xf32> to vector<40x128xbf16>
      %cst_20 = arith.constant dense<0.000000e+00> : vector<40x128xf32>
      %46 = tpu.matmul %44, %45, %cst_20 {dimension_numbers = #tpu.dot_dimension_numbers<[1], [0], [0], [1], [0, 0, 1, 1], [], []>} : vector<40x40xbf16>, vector<40x128xbf16>, vector<40x128xf32> -> vector<40x128xf32>
      %c0_21 = arith.constant 0 : index
      %c3 = arith.constant 3 : index
      %47 = vector.load %arg3[%c0_21, %c3] : memref<40x8xf32, #tpu.memory_space<vmem>>, vector<40x1xf32>
      %48 = vector.broadcast %47 : vector<40x1xf32> to vector<40x128xf32>
      %49 = arith.addf %46, %48 : vector<40x128xf32>
      %c0_22 = arith.constant 0 : index
      %c0_23 = arith.constant 0 : index
      %50 = vector.load %arg8[%c0_22, %c0_23] : memref<40x1xf32, #tpu.memory_space<vmem>>, vector<40x1xf32>
      %cst_24 = arith.constant 1.250000e-01 : f32
      %51 = vector.broadcast %cst_24 : f32 to vector<40x1xf32>
      %52 = arith.mulf %50, %51 : vector<40x1xf32>
      %c0_25 = arith.constant 0 : index
      %c0_26 = arith.constant 0 : index
      %53 = vector.load %arg9[%c0_25, %c0_26] : memref<40x1xf32, #tpu.memory_space<vmem>>, vector<40x1xf32>
      %cst_27 = arith.constant 1.250000e-01 : f32
      %54 = vector.broadcast %cst_27 : f32 to vector<40x1xf32>
      %55 = arith.mulf %53, %54 : vector<40x1xf32>
      %56 = arith.mulf %52, %52 : vector<40x1xf32>
      %57 = arith.subf %55, %56 : vector<40x1xf32>
      %c0_28 = arith.constant 0 : index
      %c4 = arith.constant 4 : index
      %58 = vector.load %arg3[%c0_28, %c4] : memref<40x8xf32, #tpu.memory_space<vmem>>, vector<40x1xf32>
      %c0_29 = arith.constant 0 : index
      %c5 = arith.constant 5 : index
      %59 = vector.load %arg3[%c0_29, %c5] : memref<40x8xf32, #tpu.memory_space<vmem>>, vector<40x1xf32>
      %cst_30 = arith.constant 9.99999974E-6 : f32
      %60 = vector.broadcast %cst_30 : f32 to vector<40x1xf32>
      %61 = arith.addf %57, %60 : vector<40x1xf32>
      %62 = math.rsqrt %61 : vector<40x1xf32>
      %63 = arith.mulf %58, %62 : vector<40x1xf32>
      %64 = vector.broadcast %52 : vector<40x1xf32> to vector<40x128xf32>
      %65 = arith.subf %49, %64 : vector<40x128xf32>
      %66 = vector.broadcast %63 : vector<40x1xf32> to vector<40x128xf32>
      %67 = arith.mulf %66, %65 : vector<40x128xf32>
      %68 = vector.broadcast %59 : vector<40x1xf32> to vector<40x128xf32>
      %69 = arith.addf %67, %68 : vector<40x128xf32>
      %cst_31 = arith.constant 0.000000e+00 : f32
      %70 = vector.broadcast %cst_31 : f32 to vector<40x128xf32>
      %71 = arith.maximumf %69, %70 : vector<40x128xf32>
      %c0_32 = arith.constant 0 : index
      %c6 = arith.constant 6 : index
      %72 = vector.load %arg3[%c0_32, %c6] : memref<40x8xf32, #tpu.memory_space<vmem>>, vector<40x1xf32>
      %c0_33 = arith.constant 0 : index
      %c7 = arith.constant 7 : index
      %73 = vector.load %arg3[%c0_33, %c7] : memref<40x8xf32, #tpu.memory_space<vmem>>, vector<1x1xf32>
      %74 = vector.broadcast %72 : vector<40x1xf32> to vector<40x128xf32>
      %75 = arith.mulf %71, %74 : vector<40x128xf32>
      %cst_34 = arith.constant dense<0.000000e+00> : vector<128xf32>
      %76 = vector.multi_reduction <add>, %75, %cst_34 [0] : vector<40x128xf32> to vector<128xf32>
      %77 = vector.shape_cast %76 : vector<128xf32> to vector<1x128xf32>
      %78 = vector.broadcast %73 : vector<1x1xf32> to vector<1x128xf32>
      %79 = arith.addf %77, %78 : vector<1x128xf32>
      %c0_35 = arith.constant 0 : index
      %c0_36 = arith.constant 0 : index
      %80 = vector.load %arg5[%c0_35, %c0_36] : memref<1x128xf32, #tpu.memory_space<vmem>>, vector<1x128xf32>
      tpu.vector_store %arg5[%c0_35, %c0_36], %79 {strides = array<i32>} : memref<1x128xf32, #tpu.memory_space<vmem>>, vector<1x128xf32>,
    } else {
    }
    return
  }
  func.func @transform_0(%arg0: i32, %arg1: i32) -> (i32, i32) {
    %c0_i32 = arith.constant 0 : i32
    %c0_i32_0 = arith.constant 0 : i32
    return %c0_i32, %arg1 : i32, i32
  }
  func.func @transform_1(%arg0: i32, %arg1: i32) -> (i32, i32) {
    %c0_i32 = arith.constant 0 : i32
    %c0_i32_0 = arith.constant 0 : i32
    %c0_i32_1 = arith.constant 0 : i32
    return %c0_i32, %c0_i32_0 : i32, i32
  }
  func.func @transform_2(%arg0: i32, %arg1: i32) -> (i32, i32) {
    %c0_i32 = arith.constant 0 : i32
    %c0_i32_0 = arith.constant 0 : i32
    %c0_i32_1 = arith.constant 0 : i32
    return %c0_i32, %c0_i32_0 : i32, i32
  }
  func.func @transform_3(%arg0: i32, %arg1: i32) -> (i32, i32) {
    %c0_i32 = arith.constant 0 : i32
    %c0_i32_0 = arith.constant 0 : i32
    return %c0_i32, %arg1 : i32, i32
  }
}

</mosaic_0001>

<bundles_post_ra>
// kernel: regression_forward.1
= control target key start
LH: loop header
LB: loop body
LE: loop exit
PB: predicated region body
PF: predicated region fallthrough
CT: control target
= control target key end

     0   :  { %s1279_s12 = smov 0   ;;  %s1281_s13 = smov 0   ;;  %s1581_s0 = inlined_call_operand.vmem [shape: f32[1,128], index: 0, kind: input, shape index: {}]   ;;  %s1582_s1 = inlined_call_operand.vmem [shape: f32[40,8], index: 1, kind: input, shape index: {}]   ;;  %s1583_s2 = inlined_call_operand.vmem [shape: f32[40,40], index: 2, kind: input, shape index: {}]   ;;  %s1584_s3 = inlined_call_operand.vmem [shape: f32[1,128], index: 3, kind: output, shape index: {}]  }
   0x1   :  { %s1283_s14 = smov 0  }
   0x2 LB: > { %s25_s15 = sadd.s32 1, %s1235_s13  ;;  %p1034_p0 = scmp.ge.s32.totalorder %s1239_s14, 1  ;;  %s1239_s14 = sphi %s1283_s14, %s13_s14   ;;  %s1235_s13 = sphi %s1281_s13, %s1586_s13   ;;  %s1231_s12 = sphi %s1279_s12, %s1585_s12  }
   0x3   : > { %p27_p1 = scmp.ge.s32.totalorder %s25_s15, 3  ;;  %p147_p2 = scmp.lt.s32.totalorder %s1239_s14, 4 }
   0x5   : > { %s1588_s15 = smov (%p27_p1, %s25_s15), 0  ;;  %p148_p3 = pnand %p1034_p0, %p147_p2 }
   0x6   : > { %p174_p4 = scmp.eq.s32.totalorder (!%p148_p3), %s1231_s12, 0 }
   0x7   : > { %151 = sbr.rel (%p148_p3) target bundleno = 1359 (0x54f), region = 32 }
   0xe   : > { %179 = sbr.rel (!%p174_p4) target bundleno = 21 (0x15), region = 36  ;;  %vm180_vm0 = vcmask (%p174_p4), 0   ;;  %vm183_vm1 = vcmask (%p174_p4), 7168   ;;  %v1241_v0 = vmov (%p174_p4), 0.0  }
   0xf   : > { %181 = vst.msk [vmem:[#allocation2] sm:$0x1] (%p174_p4), %vm180_vm0, %v1241_v0  ;;  %182 = vst.msk [vmem:[#allocation3] sm:$0x1] (%p174_p4), %vm180_vm0, %v1241_v0 }
  0x10   : > { %184 = vst.msk [vmem:[#allocation4] sm:$0xff] (%p174_p4), %vm183_vm1, %v1241_v0  ;;  %185 = vst.msk [vmem:[#allocation4 + $0x8] sm:$0xff] (%p174_p4), %vm183_vm1, %v1241_v0 }
  0x11   : > { %186 = vst.msk [vmem:[#allocation4 + $0x10] sm:$0xff] (%p174_p4), %vm183_vm1, %v1241_v0  ;;  %187 = vst.msk [vmem:[#allocation4 + $0x18] sm:$0xff] (%p174_p4), %vm183_vm1, %v1241_v0 }
  0x12   : > { %188 = vst.msk [vmem:[#allocation4 + $0x20] sm:$0xff] (%p174_p4), %vm183_vm1, %v1241_v0  ;;  %189 = vst.msk [vmem:[#allocation5] sm:$0xff] (%p174_p4), %vm183_vm1, %v1241_v0 }
  0x13   : > { %190 = vst.msk [vmem:[#allocation5 + $0x8] sm:$0xff] (%p174_p4), %vm183_vm1, %v1241_v0  ;;  %191 = vst.msk [vmem:[#allocation5 + $0x10] sm:$0xff] (%p174_p4), %vm183_vm1, %v1241_v0 }
  0x14   : > { %192 = vst.msk [vmem:[#allocation5 + $0x18] sm:$0xff] (%p174_p4), %vm183_vm1, %v1241_v0  ;;  %193 = vst.msk [vmem:[#allocation5 + $0x20] sm:$0xff] (%p174_p4), %vm183_vm1, %v1241_v0 }
  0x15 PF: > { %p1036_p5 = scmp.ne.s32.totalorder %s1231_s12, 0 }
  0x16   : > { %v197_v1 = vld [vmem:[%s1581_s0] sm:$0x1] (!%p1036_p5)  ;;  %vm199_vm2 = vcmask (!%p1036_p5), 1040384   ;;  %vm204_vm3 = vcmask (!%p1036_p5), 0   ;;  %v206_v8 = vld [vmem:[#allocation3] sm:$0x1] (!%p1036_p5) }
  0x17   : > { %196 = sbr.rel (%p1036_p5) target bundleno = 173 (0xad), region = 40  ;;  %v200_v2 = vsel (!%p1036_p5), %vm199_vm2, %v197_v1, 0.0  ;;  %v207_v3 = vmul.f32 (!%p1036_p5), %v197_v1, %v197_v1  ;;  %v198_v5 = vld [vmem:[#allocation2] sm:$0x1] (!%p1036_p5) }
  0x18   : > { %201 = vadd.xlane.f32.xlu0 (!%p1036_p5), %v200_v2 }
  0x19   : > { %v208_v4 = vsel (!%p1036_p5), %vm199_vm2, %v207_v3, 0.0 }
  0x1c   : > { %209 = vadd.xlane.f32.xlu0 (!%p1036_p5), %v208_v4 }
  0xa5   : > { %v202_v6 = vpop.xlane.xlu0 %201 }
  0xa6   : > { %v203_v7 = vadd.f32 %v202_v6, %v198_v5 }
  0xa8   : > { %205 = vst.msk [vmem:[#allocation2] sm:$0x1] %vm204_vm3, %v203_v7 }
  0xa9   : > { %v210_v9 = vpop.xlane.xlu0 %209 }
  0xaa   : > { %v211_v10 = vadd.f32 %v210_v9, %v206_v8 }
  0xac   : > { %212 = vst.msk [vmem:[#allocation3] sm:$0x1] %vm204_vm3, %v211_v10 }
  0xad PF: > { %p1037_p6 = scmp.ne.s32.totalorder %s1231_s12, 1 }
  0xae   : > { %v1308_v11 = vld [vmem:[%s1582_s1] sm:$0xff] (!%p1037_p6)  ;;  %v1313_v12 = vld [vmem:[%s1582_s1 + $0x10] sm:$0xff] (!%p1037_p6)  ;;  %s1242_s22 = smov (!%p1037_p6), 127   ;;  %v1320_v13 = vld [vmem:[%s1582_s1 + $0x8] sm:$0xff] (!%p1037_p6)  ;;  %v1243_v15 = vmov (!%p1037_p6), 0   ;;  %v1244_v16 = vmov (!%p1037_p6), 2   ;;  %v259_v20 = vlaneseq (!%p1037_p6) }
  0xaf   : > { %216 = sbr.rel (%p1037_p6) target bundleno = 830 (0x33e), region = 44  ;;  %233 = vrot.lane.b32.xlu0 (!%p1037_p6), %v1308_v11, %s1242_s22  ;;  %237 = vrot.lane.b32.xlu1 (!%p1037_p6), %v1313_v12, %s1242_s22  ;;  %v1325_v14 = vld [vmem:[%s1582_s1 + $0x18] sm:$0xff] (!%p1037_p6)  ;;  %v217_v17 = vld [vmem:[#allocation2] sm:$0x1] (!%p1037_p6)  ;;  %v253_v27 = vmul.f32 (!%p1037_p6), %v1308_v11, %v1308_v11  ;;  %v254_v29 = vmul.f32 (!%p1037_p6), %v1320_v13, %v1320_v13  ;;  %v255_v31 = vmul.f32 (!%p1037_p6), %v1313_v12, %v1313_v12  ;;  %v1245_v63 = vmov (!%p1037_p6), 0.0  }
  0xb0   : > { %1152 = vset.pattern.permute.xlu1 (!%p1037_p6), %v1243_v15  ;;  %1154 = vset.pattern.permute.xlu0 (!%p1037_p6), %v1244_v16  ;;  %v1334_v18 = vld [vmem:[%s1582_s1 + $0x20] sm:$0xff] (!%p1037_p6)  ;;  %v218_v19 = vmul.f32 (!%p1037_p6), 0.125, %v217_v17  ;;  %v260_v23 = vshrl.u32 (!%p1037_p6), %v259_v20, 7  ;;  %v256_v35 = vmul.f32 (!%p1037_p6), %v1325_v14, %v1325_v14  ;;  %vm1246_vm4 = vmmov (!%p1037_p6), 0  }
  0xb1   : > { %v257_v32 = vmul.f32 (!%p1037_p6), %v1334_v18, %v1334_v18  ;;  %1062 = vmatprep.subr.bf16.mxu0 (!%p1037_p6), %v1245_v63  ;;  %1098 = vmatprep.subr.bf16.mxu1 (!%p1037_p6), %v1245_v63  ;;  %v1247_v0 = vmov (!%p1037_p6), 3   ;;  %v284_v3 = vld [vmem:[%s1581_s0] sm:$0x1] (!%p1037_p6)  ;;  %vm402_vm5 = vcmask (!%p1037_p6), 1043456   ;;  %vm392_vm6 = vcmask (!%p1037_p6), 326656  }
  0xb2   : > { %v221_v24 = vmul.f32 (!%p1037_p6), %v218_v19, %v218_v19  ;;  %v1343_v25 = vsub.s32 (!%p1037_p6), 0, %v260_v23  ;;  %1068 = vmatprep.mubr.msk.bf16.mxu0 (!%p1037_p6), %vm1246_vm4, %v1245_v63  ;;  %1072 = vmatprep.mubr.msk.bf16.mxu1 (!%p1037_p6), %vm1246_vm4, %v1245_v63  ;;  %vm495_vm8 = vcmask (!%p1037_p6), 7168  }
  0xb3   : > { %235 = vrot.lane.b32.xlu0 (!%p1037_p6), %v1320_v13, %s1242_s22  ;;  %239 = vrot.lane.b32.xlu1 (!%p1037_p6), %v1325_v14, %s1242_s22  ;;  %v219_v21 = vld [vmem:[#allocation3] sm:$0x1] (!%p1037_p6) }
  0xb4   : > { %v220_v22 = vmul.f32 (!%p1037_p6), 0.125, %v219_v21 }
  0xb6   : > { %v222_v26 = vsub.f32 %v220_v22, %v221_v24 }
  0xb7   : > { %241 = vrot.lane.b32.xlu0 %v1334_v18, %s1242_s22  ;;  %287 = vperm.xlu1 %1152, %v218_v19  }
  0xb8   : > { %v262_v28 = vrot.slane %v222_v26, %v1343_v25 }
  0xba   : > { %v264_v30 = vmul.f32 %v262_v28, %v253_v27  ;;  %v265_v34 = vmul.f32 %v262_v28, %v254_v29  ;;  %v266_v36 = vmul.f32 %v262_v28, %v255_v31  ;;  %v268_v38 = vmul.f32 %v262_v28, %v257_v32 }
  0xbb   : > { %336 = vperm.xlu0 %1154, %v1320_v13   ;;  %1153 = vset.pattern.permute.xlu1 %v1244_v16  ;;  %v267_v40 = vmul.f32 %v262_v28, %v256_v35  ;;  %v362_v35 = vld [vmem:[%s1583_s2 + $0x8] sm:$0xff] }
  0xbc   : > { %332 = vperm.xlu1 %1153, %v1308_v11   ;;  %v269_v33 = vadd.f32 1e-05, %v264_v30  ;;  %v270_v37 = vadd.f32 1e-05, %v265_v34  ;;  %v271_v39 = vadd.f32 1e-05, %v266_v36 }
  0xbd   : > { %v273_v41 = vadd.f32 1e-05, %v268_v38  ;;  %v272_v42 = vadd.f32 1e-05, %v267_v40  ;;  %v361_v34 = vld [vmem:[%s1583_s2] sm:$0xff]  ;;  %v363_v36 = vld [vmem:[%s1583_s2 + $0x10] sm:$0xff] }
  0xbe   : > { %1162 = vrsqrt.f32 %v269_v33  ;;  %v366_v40 = vpack.c.bf16 %v362_v35, %v361_v34 }
  0xbf   : > { %1155 = vset.pattern.permute.xlu0 %v1243_v15  ;;  %1164 = vrsqrt.f32 %v270_v37  ;;  %v364_v37 = vld [vmem:[%s1583_s2 + $0x18] sm:$0xff] }
  0xc0   : > { %1157 = vset.pattern.permute.xlu1 %v1243_v15  ;;  %1166 = vrsqrt.f32 %v271_v39 }
  0xc1   : > { %1168 = vrsqrt.f32 %v273_v41  ;;  %v367_v41 = vpack.c.bf16 %v364_v37, %v363_v36 }
  0xc2   : > { %1170 = vrsqrt.f32 %v272_v42  ;;  %v365_v42 = vld [vmem:[%s1583_s2 + $0x20] sm:$0xff] }
  0xc8   : > { %v1163_v43 = vpop.eup %1162 }
  0xc9   : > { %v1165_v48 = vpop.eup %1164 }
  0xca   : > { %v1167_v52 = vpop.eup %1166 }
  0xcb   : > { %v1169_v55 = vpop.eup %1168 }
  0xcc   : > { %v1171_v60 = vpop.eup %1170 }
 0x121   : > { %v234_v44 = vpop.permute.xlu0 %233  ;;  %v238_v45 = vpop.permute.xlu1 %237 }
 0x122   : > { %v248_v46 = vmul.f32 %v234_v44, %v1308_v11  ;;  %v250_v51 = vmul.f32 %v238_v45, %v1313_v12 }
 0x124   : > { %v279_v47 = vmul.f32 %v1163_v43, %v248_v46  ;;  %v281_v57 = vmul.f32 %v1167_v52, %v250_v51  ;;  %v368_v43 = vpack.c.bf16 %v365_v42, %v365_v42  ;;  %v463_v46 = vand.u32 127, %v259_v20 }
 0x125   : > { %v236_v49 = vpop.permute.xlu0 %235  ;;  %v240_v53 = vpop.permute.xlu1 %239 }
 0x126   : > { %v249_v50 = vmul.f32 %v236_v49, %v1320_v13  ;;  %297 = vperm.xlu0 %1155, %v279_v47   ;;  %v251_v59 = vmul.f32 %v240_v53, %v1325_v14  ;;  %vm467_vm7 = vcmp.lt.s32.totalorder %v463_v46, 8 }
 0x127   : > { %v1041_v51 = vsel %vm467_vm7, 1.0, %v1245_v63 }
 0x128   : > { %v280_v54 = vmul.f32 %v1165_v48, %v249_v50  ;;  %v282_v62 = vmul.f32 %v1171_v60, %v251_v59 }
 0x129   : > { %v242_v56 = vpop.permute.xlu0 %241 }
 0x12a   : > { %302 = vperm.xlu1 %1157, %v280_v54   ;;  %1156 = vset.pattern.permute.xlu0 %v1244_v16  ;;  %v252_v58 = vmul.f32 %v242_v56, %v1334_v18 }
 0x12b   : > { %340 = vperm.xlu0 %1156, %v1313_v12  }
 0x12c   : > { %v283_v61 = vmul.f32 %v1169_v55, %v252_v58 }
 0x12e   : > { %307 = vperm.xlu1 %1157, %v281_v57  }
 0x12f   : > { %1159 = vset.pattern.permute.xlu0 %v1243_v15 }
 0x130   : > { %317 = vperm.xlu0 %1159, %v283_v61  }
 0x132   : > { %312 = vperm.xlu1 %1157, %v282_v62  }
 0x134   : > { %1161 = vset.pattern.permute.xlu0 %v1247_v0 }
 0x135   : > { %377 = vperm.xlu0 %1161, %v1320_v13  }
 0x136   : > { %1158 = vset.pattern.permute.xlu1 %v1244_v16  ;;  %v288_v1 = vpop.permute.xlu1 %287 }
 0x137   : > { %344 = vperm.xlu1 %1158, %v1325_v14   ;;  %v293_v2 = vrot.slane %v288_v1, %v1343_v25 }
 0x139   : > { %389 = vperm.xlu0 %1161, %v1334_v18   ;;  %v294_v4 = vsub.f32 %v284_v3, %v293_v2 }
 0x13a   : > { %v337_v5 = vpop.permute.xlu0 %336 }
 0x13b   : > { %348 = vperm.xlu1 %1158, %v1334_v18   ;;  %v324_v6 = vrot.slane %v294_v4, %v1343_v25  ;;  %v333_v7 = vpop.permute.xlu1 %332 }
 0x13f   : > { %1160 = vset.pattern.permute.xlu1 %v1247_v0 }
 0x140   : > { %373 = vperm.xlu1 %1160, %v1308_v11  }
 0x144   : > { %381 = vperm.xlu1 %1160, %v1313_v12  }
 0x148   : > { %385 = vperm.xlu1 %1160, %v1325_v14  }
 0x1a5   : > { %v298_v8 = vpop.permute.xlu0 %297 }
 0x1a6   : > { %v326_v9 = vmul.f32 %v324_v6, %v298_v8 }
 0x1a8   : > { %v351_v11 = vadd.f32 %v333_v7, %v326_v9 }
 0x1a9   : > { %v303_v10 = vpop.permute.xlu1 %302 }
 0x1aa   : > { %v327_v12 = vmul.f32 %v324_v6, %v303_v10  ;;  %v356_v14 = vmax.f32 %v351_v11, 0.0  ;;  %v341_v17 = vpop.permute.xlu0 %340 }
 0x1ac   : > { %v352_v13 = vadd.f32 %v337_v5, %v327_v12 }
 0x1ad   : > { %v308_v15 = vpop.permute.xlu1 %307 }
 0x1ae   : > { %v357_v16 = vmax.f32 %v352_v13, 0.0  ;;  %v328_v19 = vmul.f32 %v324_v6, %v308_v15  ;;  %v475_v13 = vld [vmem:[#allocation4] sm:$0xff]  ;;  %v477_v15 = vld [vmem:[#allocation4 + $0x10] sm:$0xff] }
 0x1af   : > { %v318_v24 = vpop.permute.xlu0 %317 }
 0x1b0   : > { %v369_v18 = vpack.c.bf16 %v357_v16, %v356_v14  ;;  %v353_v22 = vadd.f32 %v341_v17, %v328_v19  ;;  %v330_v28 = vmul.f32 %v324_v6, %v318_v24  ;;  %v478_v19 = vld [vmem:[#allocation4 + $0x18] sm:$0xff] }
 0x1b1   : > { %v313_v21 = vpop.permute.xlu1 %312 }
 0x1b2   : > { %1063 = vmatpush3.bf16.msra.mxu0 %v369_v18  ;;  %1101 = vmatpush3.bf16.msra.mxu1 %v369_v18  ;;  %v329_v23 = vmul.f32 %v324_v6, %v313_v21  ;;  %v358_v27 = vmax.f32 %v353_v22, 0.0  ;;  %v476_v21 = vld [vmem:[#allocation4 + $0x8] sm:$0xff] }
 0x1b3   : > { %1064 = vmatprep.subr.bf16.mxu0 %v1245_v63  ;;  %1099 = vmatprep.subr.bf16.mxu1 %v1245_v63 }
 0x1b4   : > { %v378_v48 = vpop.permute.xlu0 %377 }
 0x1b6   : > { %v345_v25 = vpop.permute.xlu1 %344 }
 0x1b7   : > { %v354_v26 = vadd.f32 %v345_v25, %v329_v23 }
 0x1b8   : > { %v390_v3 = vpop.permute.xlu0 %389 }
 0x1b9   : > { %v359_v29 = vmax.f32 %v354_v26, 0.0  ;;  %v501_v26 = vld [vmem:[#allocation5] sm:$0xff] }
 0x1ba   : > { %v349_v30 = vpop.permute.xlu1 %348 }
 0x1bb   : > { %v370_v31 = vpack.c.bf16 %v359_v29, %v358_v27  ;;  %v355_v32 = vadd.f32 %v349_v30, %v330_v28  ;;  %v502_v27 = vld [vmem:[#allocation5 + $0x8] sm:$0xff] }
 0x1bd   : > { %v360_v33 = vmax.f32 %v355_v32, 0.0  ;;  %1065 = vmatpush3.bf16.msra.mxu0 %v370_v31  ;;  %1102 = vmatpush3.bf16.msra.mxu1 %v370_v31  ;;  %v503_v32 = vld [vmem:[#allocation5 + $0x10] sm:$0xff] }
 0x1be   : > { %1066 = vmatprep.subr.bf16.mxu0 %v1245_v63  ;;  %1100 = vmatprep.subr.bf16.mxu1 %v1245_v63 }
 0x1bf   : > { %v371_v38 = vpack.c.bf16 %v360_v33, %v360_v33  ;;  %v374_v44 = vpop.permute.xlu1 %373  ;;  %v479_v33 = vld [vmem:[#allocation4 + $0x20] sm:$0xff] }
 0x1c1   : > { %v404_v39 = vsel %vm402_vm5, %v371_v38, 0  ;;  %v505_v38 = vld [vmem:[#allocation5 + $0x20] sm:$0xff] }
 0x1c2   : > { %1067 = vmatpush3.bf16.msra.mxu0 %v404_v39  ;;  %1103 = vmatpush3.bf16.msra.mxu1 %v404_v39  ;;  %v504_v39 = vld [vmem:[#allocation5 + $0x18] sm:$0xff] }
 0x1c3   : > { %v382_v45 = vpop.permute.xlu1 %381 }
 0x1c5   : > { %1069 = vmatmul.mubr.msk.bf16.vlgmr.msra.gmra.mrb[0].mxu0 %vm392_vm6, %v366_v40  ;;  %1073 = vmatmul.mubr.msk.bf16.vlgmr.msra.gmra.mrb[0].mxu1 %vm392_vm6, %v367_v41 }
 0x1c6   : > { %1076 = vmatprep.mubr.msk.bf16.mxu1 %vm1246_vm4, %v1245_v63 }
 0x1c7   : > { %v386_v47 = vpop.permute.xlu1 %385 }
 0x1cd   : > { %1077 = vmatmul.mubr.msk.bf16.gmra.mrb[4].mxu1 %vm392_vm6, %v368_v43 }
 0x298   : > { %v440_v49 = vpop.f32.mrb[0].mxu0  ;;  %v448_v50 = vpop.f32.mrb[0].mxu1 }
 0x299   : > { %v441_v52 = vadd.f32 %v440_v49, %v374_v44  ;;  %v449_v53 = vadd.f32 %v448_v50, %v382_v45  ;;  %v1070_v54 = vpop.f32.mrb[1].mxu0  ;;  %v1074_v55 = vpop.f32.mrb[1].mxu1 }
 0x29a   : > { %v443_v56 = vpop.f32.mrb[2].mxu0  ;;  %v451_v57 = vpop.f32.mrb[2].mxu1 }
 0x29b   : > { %v444_v58 = vadd.f32 %v443_v56, %v378_v48  ;;  %v452_v59 = vadd.f32 %v451_v57, %v386_v47  ;;  %v1071_v60 = vpop.f32.mrb[3].mxu0  ;;  %v1075_v61 = vpop.f32.mrb[3].mxu1  ;;  %v472_v62 = vmul.f32 %v1041_v51, %v449_v53  ;;  %v470_v0 = vmul.f32 %v1041_v51, %v441_v52 }
 0x29d   : > { %484 = vadd.xlane.f32.xlu0 %v472_v62  ;;  %480 = vadd.xlane.f32.xlu1 %v470_v0  ;;  %v473_v20 = vmul.f32 %v1041_v51, %v452_v59  ;;  %v471_v1 = vmul.f32 %v1041_v51, %v444_v58  ;;  %v506_v7 = vmul.f32 %v470_v0, %v470_v0 }
 0x29e   : > { %v508_v9 = vmul.f32 %v472_v62, %v472_v62 }
 0x29f   : > { %v507_v8 = vmul.f32 %v471_v1, %v471_v1  ;;  %v509_v11 = vmul.f32 %v473_v20, %v473_v20 }
 0x2a0   : > { %v456_v2 = vpop.f32.mrb[4].mxu1 }
 0x2a1   : > { %486 = vadd.xlane.f32.xlu1 %v473_v20  ;;  %482 = vadd.xlane.f32.xlu0 %v471_v1  ;;  %v1078_v63 = vpop.f32.mrb[5].mxu1  ;;  %v457_v5 = vadd.f32 %v456_v2, %v390_v3 }
 0x2a2   : > { %v459_v4 = vpop.f32.mrb[6].mxu1 }
 0x2a3   : > { %v1079_v6 = vpop.f32.mrb[7].mxu1  ;;  %v474_v10 = vmul.f32 %v1041_v51, %v457_v5 }
 0x2a5   : > { %511 = vadd.xlane.f32.xlu1 %v506_v7  ;;  %513 = vadd.xlane.f32.xlu0 %v507_v8  ;;  %v510_v12 = vmul.f32 %v474_v10, %v474_v10 }
 0x2a9   : > { %515 = vadd.xlane.f32.xlu1 %v508_v9  ;;  %488 = vadd.xlane.f32.xlu0 %v474_v10 }
 0x2ad   : > { %517 = vadd.xlane.f32.xlu0 %v509_v11  ;;  %519 = vadd.xlane.f32.xlu1 %v510_v12 }
 0x32a   : > { %v481_v14 = vpop.xlane.xlu1 %480  ;;  %v485_v16 = vpop.xlane.xlu0 %484 }
 0x32b   : > { %v490_v17 = vadd.f32 %v481_v14, %v475_v13  ;;  %v492_v18 = vadd.f32 %v485_v16, %v477_v15 }
 0x32d   : > { %496 = vst.msk [vmem:[#allocation4] sm:$0xff] %vm495_vm8, %v490_v17  ;;  %498 = vst.msk [vmem:[#allocation4 + $0x10] sm:$0xff] %vm495_vm8, %v492_v18 }
 0x32e   : > { %v487_v22 = vpop.xlane.xlu1 %486  ;;  %v483_v23 = vpop.xlane.xlu0 %482 }
 0x32f   : > { %v493_v24 = vadd.f32 %v487_v22, %v478_v19  ;;  %v491_v25 = vadd.f32 %v483_v23, %v476_v21 }
 0x331   : > { %499 = vst.msk [vmem:[#allocation4 + $0x18] sm:$0xff] %vm495_vm8, %v493_v24  ;;  %497 = vst.msk [vmem:[#allocation4 + $0x8] sm:$0xff] %vm495_vm8, %v491_v25 }
 0x332   : > { %v512_v28 = vpop.xlane.xlu1 %511  ;;  %v514_v29 = vpop.xlane.xlu0 %513 }
 0x333   : > { %v521_v30 = vadd.f32 %v512_v28, %v501_v26  ;;  %v522_v31 = vadd.f32 %v514_v29, %v502_v27 }
 0x335   : > { %526 = vst.msk [vmem:[#allocation5] sm:$0xff] %vm495_vm8, %v521_v30  ;;  %527 = vst.msk [vmem:[#allocation5 + $0x8] sm:$0xff] %vm495_vm8, %v522_v31 }
 0x336   : > { %v516_v34 = vpop.xlane.xlu1 %515  ;;  %v489_v35 = vpop.xlane.xlu0 %488 }
 0x337   : > { %v523_v36 = vadd.f32 %v516_v34, %v503_v32  ;;  %v494_v37 = vadd.f32 %v489_v35, %v479_v33 }
 0x339   : > { %528 = vst.msk [vmem:[#allocation5 + $0x10] sm:$0xff] %vm495_vm8, %v523_v36  ;;  %500 = vst.msk [vmem:[#allocation4 + $0x20] sm:$0xff] %vm495_vm8, %v494_v37 }
 0x33a   : > { %v520_v40 = vpop.xlane.xlu1 %519  ;;  %v518_v41 = vpop.xlane.xlu0 %517 }
 0x33b   : > { %v525_v42 = vadd.f32 %v520_v40, %v505_v38  ;;  %v524_v43 = vadd.f32 %v518_v41, %v504_v39 }
 0x33d   : > { %530 = vst.msk [vmem:[#allocation5 + $0x20] sm:$0xff] %vm495_vm8, %v525_v42  ;;  %529 = vst.msk [vmem:[#allocation5 + $0x18] sm:$0xff] %vm495_vm8, %v524_v43 }
 0x33e PF: > { %p1042_p7 = scmp.ne.s32.totalorder %s1231_s12, 2 }
 0x33f   : > { %v1420_v44 = vld [vmem:[%s1582_s1] sm:$0xff] (!%p1042_p7)  ;;  %v1425_v45 = vld [vmem:[%s1582_s1 + $0x10] sm:$0xff] (!%p1042_p7)  ;;  %s1248_s22 = smov (!%p1042_p7), 127   ;;  %v1432_v46 = vld [vmem:[%s1582_s1 + $0x8] sm:$0xff] (!%p1042_p7)  ;;  %v1249_v48 = vmov (!%p1042_p7), 0   ;;  %v1250_v49 = vmov (!%p1042_p7), 2   ;;  %v577_v53 = vlaneseq (!%p1042_p7) }
 0x340   : > { %534 = sbr.rel (%p1042_p7) target bundleno = 1359 (0x54f), region = 48  ;;  %551 = vrot.lane.b32.xlu0 (!%p1042_p7), %v1420_v44, %s1248_s22  ;;  %555 = vrot.lane.b32.xlu1 (!%p1042_p7), %v1425_v45, %s1248_s22  ;;  %v1437_v47 = vld [vmem:[%s1582_s1 + $0x18] sm:$0xff] (!%p1042_p7)  ;;  %v535_v50 = vld [vmem:[#allocation2] sm:$0x1] (!%p1042_p7)  ;;  %v537_v54 = vld [vmem:[#allocation3] sm:$0x1] (!%p1042_p7)  ;;  %v571_v61 = vmul.f32 (!%p1042_p7), %v1420_v44, %v1420_v44  ;;  %v572_v0 = vmul.f32 (!%p1042_p7), %v1432_v46, %v1432_v46  ;;  %v573_v20 = vmul.f32 (!%p1042_p7), %v1425_v45, %v1425_v45 }
 0x341   : > { %1172 = vset.pattern.permute.xlu1 (!%p1042_p7), %v1249_v48  ;;  %1174 = vset.pattern.permute.xlu0 (!%p1042_p7), %v1250_v49  ;;  %v1446_v51 = vld [vmem:[%s1582_s1 + $0x20] sm:$0xff] (!%p1042_p7)  ;;  %v536_v52 = vmul.f32 (!%p1042_p7), 0.125, %v535_v50  ;;  %v538_v55 = vmul.f32 (!%p1042_p7), 0.125, %v537_v54  ;;  %v578_v56 = vshrl.u32 (!%p1042_p7), %v577_v53, 7  ;;  %v781_v3 = vld [vmem:[#allocation4 + $0x8] sm:$0xff] (!%p1042_p7)  ;;  %v574_v5 = vmul.f32 (!%p1042_p7), %v1437_v47, %v1437_v47  ;;  %v791_v9 = vld [vmem:[#allocation5 + $0x8] sm:$0xff] (!%p1042_p7) }
 0x342   : > { %v575_v1 = vmul.f32 (!%p1042_p7), %v1446_v51, %v1446_v51  ;;  %v1467_v8 = vmul.f32 (!%p1042_p7), 0.125, %v781_v3  ;;  %v783_v10 = vld [vmem:[#allocation4 + $0x18] sm:$0xff] (!%p1042_p7)  ;;  %v796_v15 = vmul.f32 (!%p1042_p7), 0.125, %v791_v9  ;;  %v780_v19 = vld [vmem:[#allocation4] sm:$0xff] (!%p1042_p7)  ;;  %v790_v29 = vld [vmem:[#allocation5] sm:$0xff] (!%p1042_p7)  ;;  %v1251_v9 = vmov (!%p1042_p7), 0.0  }
 0x343   : > { %v539_v57 = vmul.f32 (!%p1042_p7), %v536_v52, %v536_v52  ;;  %v1454_v58 = vsub.s32 (!%p1042_p7), 0, %v578_v56  ;;  %v1471_v16 = vmul.f32 (!%p1042_p7), 0.125, %v783_v10  ;;  %v1475_v27 = vmul.f32 (!%p1042_p7), 0.125, %v780_v19  ;;  %v782_v30 = vld [vmem:[#allocation4 + $0x10] sm:$0xff] (!%p1042_p7)  ;;  %v792_v41 = vld [vmem:[#allocation5 + $0x10] sm:$0xff] (!%p1042_p7)  ;;  %1080 = vmatprep.subr.bf16.mxu0 (!%p1042_p7), %v1251_v9  ;;  %1104 = vmatprep.subr.bf16.mxu1 (!%p1042_p7), %v1251_v9  ;;  %s1252_s28 = smov (!%p1042_p7), 4  }
 0x344   : > { %553 = vrot.lane.b32.xlu0 (!%p1042_p7), %v1432_v46, %s1248_s22  ;;  %557 = vrot.lane.b32.xlu1 (!%p1042_p7), %v1437_v47, %s1248_s22  ;;  %v801_v14 = vmul.f32 (!%p1042_p7), %v1467_v8, %v1467_v8  ;;  %v793_v17 = vld [vmem:[#allocation5 + $0x18] sm:$0xff] (!%p1042_p7)  ;;  %v795_v36 = vmul.f32 (!%p1042_p7), 0.125, %v790_v29  ;;  %v1480_v38 = vmul.f32 (!%p1042_p7), 0.125, %v782_v30  ;;  %vm1253_vm9 = vmmov (!%p1042_p7), 0  }
 0x345   : > { %v540_v59 = vsub.f32 (!%p1042_p7), %v538_v55, %v539_v57  ;;  %v798_v22 = vmul.f32 (!%p1042_p7), 0.125, %v793_v17  ;;  %v803_v23 = vmul.f32 (!%p1042_p7), %v1471_v16, %v1471_v16  ;;  %v800_v37 = vmul.f32 (!%p1042_p7), %v1475_v27, %v1475_v27  ;;  %1086 = vmatprep.mubr.msk.bf16.mxu0 (!%p1042_p7), %vm1253_vm9, %v1251_v9  ;;  %1090 = vmatprep.mubr.msk.bf16.mxu1 (!%p1042_p7), %vm1253_vm9, %v1251_v9 }
 0x346   : > { %v806_v21 = vsub.f32 (!%p1042_p7), %v796_v15, %v801_v14  ;;  %v797_v57 = vmul.f32 (!%p1042_p7), 0.125, %v792_v41  ;;  %v1257_v19 = vmov (!%p1042_p7), 4   ;;  %vm720_vm10 = vcmask (!%p1042_p7), 1043456  }
 0x347   : > { %v580_v60 = vrot.slane %v540_v59, %v1454_v58  ;;  %v808_v32 = vsub.f32 %v798_v22, %v803_v23  ;;  %v805_v56 = vsub.f32 %v795_v36, %v800_v37  ;;  %v802_v59 = vmul.f32 %v1480_v38, %v1480_v38  ;;  %v602_v22 = vld [vmem:[%s1581_s0] sm:$0x1] }
 0x348   : > { %559 = vrot.lane.b32.xlu0 %v1446_v51, %s1248_s22  ;;  %605 = vperm.xlu1 %1172, %v536_v52   ;;  %v811_v31 = vadd.f32 1e-05, %v806_v21  ;;  %v784_v52 = vld [vmem:[#allocation4 + $0x20] sm:$0xff]  ;;  %vm710_vm11 = vcmask 326656  }
 0x349   : > { %v582_v62 = vmul.f32 %v580_v60, %v571_v61  ;;  %v583_v63 = vmul.f32 %v580_v60, %v572_v0  ;;  %v584_v4 = vmul.f32 %v580_v60, %v573_v20  ;;  %v586_v6 = vmul.f32 %v580_v60, %v575_v1  ;;  %v794_v1 = vld [vmem:[#allocation5 + $0x20] sm:$0xff] }
 0x34a   : > { %v585_v12 = vmul.f32 %v580_v60, %v574_v5  ;;  %v813_v50 = vadd.f32 1e-05, %v808_v32  ;;  %v1489_v0 = vmul.f32 0.125, %v784_v52  ;;  %v799_v5 = vmul.f32 0.125, %v794_v1 }
 0x34b   : > { %v587_v2 = vadd.f32 1e-05, %v582_v62  ;;  %v588_v7 = vadd.f32 1e-05, %v583_v63  ;;  %v589_v11 = vadd.f32 1e-05, %v584_v4  ;;  %v807_v4 = vsub.f32 %v797_v57, %v802_v59 }
 0x34c   : > { %654 = vperm.xlu0 %1174, %v1432_v46   ;;  %1173 = vset.pattern.permute.xlu1 %v1250_v49  ;;  %v591_v13 = vadd.f32 1e-05, %v586_v6  ;;  %v590_v18 = vadd.f32 1e-05, %v585_v12  ;;  %v810_v63 = vadd.f32 1e-05, %v805_v56  ;;  %v804_v6 = vmul.f32 %v1489_v0, %v1489_v0 }
 0x34d   : > { %650 = vperm.xlu1 %1173, %v1420_v44   ;;  %1197 = vrsqrt.f32 %v587_v2  ;;  %v812_v10 = vadd.f32 1e-05, %v807_v4 }
 0x34e   : > { %1199 = vrsqrt.f32 %v588_v7 }
 0x34f   : > { %1201 = vrsqrt.f32 %v589_v11  ;;  %v809_v11 = vsub.f32 %v799_v5, %v804_v6 }
 0x350   : > { %1175 = vset.pattern.permute.xlu0 %v1249_v48  ;;  %1203 = vrsqrt.f32 %v591_v13 }
 0x351   : > { %1177 = vset.pattern.permute.xlu1 %v1249_v48  ;;  %1205 = vrsqrt.f32 %v590_v18  ;;  %v814_v13 = vadd.f32 1e-05, %v809_v11  ;;  %v1255_v18 = vmov 5  }
 0x352   : > { %1207 = vrsqrt.f32 %v811_v31 }
 0x353   : > { %1209 = vrsqrt.f32 %v813_v50 }
 0x354   : > { %1211 = vrsqrt.f32 %v810_v63 }
 0x355   : > { %1213 = vrsqrt.f32 %v812_v10 }
 0x356   : > { %1215 = vrsqrt.f32 %v814_v13  ;;  %v1258_v13 = vmov 7  }
 0x357   : > { %v1198_v24 = vpop.eup %1197 }
 0x358   : > { %v1200_v34 = vpop.eup %1199 }
 0x359   : > { %v1202_v42 = vpop.eup %1201 }
 0x35a   : > { %v1204_v54 = vpop.eup %1203 }
 0x35b   : > { %v1206_v20 = vpop.eup %1205 }
 0x35c   : > { %v1208_v7 = vpop.eup %1207 }
 0x35d   : > { %v1210_v12 = vpop.eup %1209 }
 0x35e   : > { %v1212_v15 = vpop.eup %1211 }
 0x35f   : > { %v1214_v14 = vpop.eup %1213 }
 0x360   : > { %v1216_v17 = vpop.eup %1215 }
 0x3b2   : > { %v552_v25 = vpop.permute.xlu0 %551  ;;  %v556_v26 = vpop.permute.xlu1 %555 }
 0x3b3   : > { %v566_v28 = vmul.f32 %v552_v25, %v1420_v44  ;;  %v568_v40 = vmul.f32 %v556_v26, %v1425_v45 }
 0x3b5   : > { %v597_v33 = vmul.f32 %v1198_v24, %v566_v28  ;;  %v599_v60 = vmul.f32 %v1202_v42, %v568_v40 }
 0x3b6   : > { %v554_v35 = vpop.permute.xlu0 %553  ;;  %v558_v43 = vpop.permute.xlu1 %557 }
 0x3b7   : > { %v567_v39 = vmul.f32 %v554_v35, %v1432_v46  ;;  %615 = vperm.xlu0 %1175, %v597_v33   ;;  %v569_v62 = vmul.f32 %v558_v43, %v1437_v47 }
 0x3b9   : > { %v598_v53 = vmul.f32 %v1200_v34, %v567_v39  ;;  %v600_v3 = vmul.f32 %v1206_v20, %v569_v62  ;;  %v682_v62 = vld [vmem:[%s1583_s2 + $0x18] sm:$0xff] }
 0x3ba   : > { %v560_v55 = vpop.permute.xlu0 %559 }
 0x3bb   : > { %620 = vperm.xlu1 %1177, %v598_v53   ;;  %1176 = vset.pattern.permute.xlu0 %v1250_v49  ;;  %v570_v61 = vmul.f32 %v560_v55, %v1446_v51 }
 0x3bc   : > { %658 = vperm.xlu0 %1176, %v1425_v45  }
 0x3bd   : > { %v601_v2 = vmul.f32 %v1204_v54, %v570_v61  ;;  %v681_v61 = vld [vmem:[%s1583_s2 + $0x10] sm:$0xff] }
 0x3be   : > { %v685_v4 = vpack.c.bf16 %v682_v62, %v681_v61 }
 0x3bf   : > { %625 = vperm.xlu1 %1177, %v599_v60   ;;  %v679_v60 = vld [vmem:[%s1583_s2] sm:$0xff] }
 0x3c0   : > { %1179 = vset.pattern.permute.xlu0 %v1249_v48 }
 0x3c1   : > { %635 = vperm.xlu0 %1179, %v601_v2  }
 0x3c3   : > { %630 = vperm.xlu1 %1177, %v600_v3  }
 0x3c5   : > { %827 = vrot.lane.b32.xlu0 %v1208_v7, %s1252_s28 }
 0x3c7   : > { %1178 = vset.pattern.permute.xlu1 %v1250_v49  ;;  %v1254_v49 = vmov 3  }
 0x3c8   : > { %662 = vperm.xlu1 %1178, %v1437_v47   ;;  %1180 = vset.pattern.permute.xlu0 %v1254_v49 }
 0x3c9   : > { %831 = vrot.lane.b32.xlu0 %v1210_v12, %s1252_s28 }
 0x3cb   : > { %v655_v24 = vpop.permute.xlu0 %654 }
 0x3cc   : > { %666 = vperm.xlu1 %1178, %v1446_v51  }
 0x3cd   : > { %691 = vperm.xlu0 %1180, %v1420_v44  }
 0x3d0   : > { %825 = vrot.lane.b32.xlu1 %v1212_v15, %s1252_s28 }
 0x3d1   : > { %1181 = vset.pattern.permute.xlu1 %v1254_v49  ;;  %1182 = vset.pattern.permute.xlu0 %v1249_v48 }
 0x3d2   : > { %847 = vperm.xlu0 %1182, %v1475_v27  }
 0x3d4   : > { %829 = vrot.lane.b32.xlu1 %v1214_v14, %s1252_s28 }
 0x3d6   : > { %857 = vperm.xlu0 %1182, %v1480_v38  }
 0x3d8   : > { %833 = vrot.lane.b32.xlu1 %v1216_v17, %s1252_s28 }
 0x3da   : > { %1187 = vset.pattern.permute.xlu0 %v1255_v18 }
 0x3db   : > { %910 = vperm.xlu0 %1187, %v1432_v46  }
 0x3dc   : > { %695 = vperm.xlu1 %1181, %v1432_v46  }
 0x3df   : > { %914 = vperm.xlu0 %1187, %v1425_v45  }
 0x3e0   : > { %699 = vperm.xlu1 %1181, %v1425_v45  }
 0x3e3   : > { %918 = vperm.xlu0 %1187, %v1437_v47  }
 0x3e4   : > { %1183 = vset.pattern.permute.xlu1 %v1249_v48 }
 0x3e5   : > { %852 = vperm.xlu1 %1183, %v1467_v8   ;;  %v1256_v8 = vmov 6  }
 0x3e7   : > { %1190 = vset.pattern.permute.xlu0 %v1256_v8 }
 0x3e8   : > { %941 = vperm.xlu0 %1190, %v1432_v46  }
 0x3e9   : > { %1184 = vset.pattern.permute.xlu1 %v1254_v49 }
 0x3ea   : > { %703 = vperm.xlu1 %1184, %v1437_v47  }
 0x3ec   : > { %1193 = vset.pattern.permute.xlu0 %v1257_v19 }
 0x3ee   : > { %707 = vperm.xlu1 %1184, %v1446_v51  }
 0x3f2   : > { %1185 = vset.pattern.permute.xlu1 %v1249_v48 }
 0x3f3   : > { %862 = vperm.xlu1 %1185, %v1471_v16   ;;  %v606_v16 = vpop.permute.xlu1 %605 }
 0x3f4   : > { %v611_v21 = vrot.slane %v606_v16, %v1454_v58 }
 0x3f6   : > { %v612_v23 = vsub.f32 %v602_v22, %v611_v21 }
 0x3f7   : > { %1186 = vset.pattern.permute.xlu1 %v1255_v18  ;;  %v651_v25 = vpop.permute.xlu1 %650 }
 0x3f8   : > { %906 = vperm.xlu1 %1186, %v1420_v44  }
 0x3fc   : > { %1188 = vset.pattern.permute.xlu1 %v1249_v48  ;;  %v642_v48 = vrot.slane %v612_v23, %v1454_v58 }
 0x3fd   : > { %867 = vperm.xlu1 %1188, %v1489_v0  }
 0x401   : > { %1189 = vset.pattern.permute.xlu1 %v1256_v8 }
 0x402   : > { %937 = vperm.xlu1 %1189, %v1420_v44  }
 0x406   : > { %1191 = vset.pattern.permute.xlu1 %v1255_v18 }
 0x407   : > { %922 = vperm.xlu1 %1191, %v1446_v51  }
 0x40b   : > { %1192 = vset.pattern.permute.xlu1 %v1257_v19 }
 0x436   : > { %v616_v26 = vpop.permute.xlu0 %615 }
 0x437   : > { %v644_v27 = vmul.f32 %v642_v48, %v616_v26 }
 0x439   : > { %v669_v29 = vadd.f32 %v651_v25, %v644_v27 }
 0x43a   : > { %v621_v28 = vpop.permute.xlu1 %620 }
 0x43b   : > { %v645_v30 = vmul.f32 %v642_v48, %v621_v28  ;;  %v659_v31 = vpop.permute.xlu0 %658  ;;  %v674_v34 = vmax.f32 %v669_v29, 0.0 }
 0x43d   : > { %v670_v32 = vadd.f32 %v655_v24, %v645_v30 }
 0x43e   : > { %v626_v33 = vpop.permute.xlu1 %625 }
 0x43f   : > { %v675_v35 = vmax.f32 %v670_v32, 0.0  ;;  %v646_v38 = vmul.f32 %v642_v48, %v626_v33 }
 0x440   : > { %v636_v36 = vpop.permute.xlu0 %635 }
 0x441   : > { %v687_v37 = vpack.c.bf16 %v675_v35, %v674_v34  ;;  %v671_v41 = vadd.f32 %v659_v31, %v646_v38  ;;  %v648_v53 = vmul.f32 %v642_v48, %v636_v36 }
 0x442   : > { %v631_v39 = vpop.permute.xlu1 %630 }
 0x443   : > { %1081 = vmatpush3.bf16.msra.mxu0 %v687_v37  ;;  %1107 = vmatpush3.bf16.msra.mxu1 %v687_v37  ;;  %v647_v42 = vmul.f32 %v642_v48, %v631_v39  ;;  %v676_v52 = vmax.f32 %v671_v41, 0.0 }
 0x444   : > { %1082 = vmatprep.subr.bf16.mxu0 %v1251_v9  ;;  %1105 = vmatprep.subr.bf16.mxu1 %v1251_v9  ;;  %v828_v58 = vpop.permute.xlu0 %827 }
 0x445   : > { %v841_v40 = vmul.f32 %v828_v58, %v1432_v46  ;;  %v680_v46 = vld [vmem:[%s1583_s2 + $0x8] sm:$0xff] }
 0x446   : > { %v684_v3 = vpack.c.bf16 %v680_v46, %v679_v60 }
 0x447   : > { %v663_v43 = vpop.permute.xlu1 %662  ;;  %882 = vperm.xlu0 %1193, %v841_v40  }
 0x448   : > { %v672_v50 = vadd.f32 %v663_v43, %v647_v42  ;;  %v832_v2 = vpop.permute.xlu0 %831 }
 0x449   : > { %v843_v6 = vmul.f32 %v832_v2, %v1437_v47 }
 0x44a   : > { %v677_v54 = vmax.f32 %v672_v50, 0.0 }
 0x44b   : > { %v667_v55 = vpop.permute.xlu1 %666 }
 0x44c   : > { %v688_v56 = vpack.c.bf16 %v677_v54, %v676_v52  ;;  %v673_v57 = vadd.f32 %v667_v55, %v648_v53 }
 0x44e   : > { %v678_v59 = vmax.f32 %v673_v57, 0.0  ;;  %1083 = vmatpush3.bf16.msra.mxu0 %v688_v56  ;;  %1108 = vmatpush3.bf16.msra.mxu1 %v688_v56 }
 0x44f   : > { %1084 = vmatprep.subr.bf16.mxu0 %v1251_v9  ;;  %1106 = vmatprep.subr.bf16.mxu1 %v1251_v9  ;;  %v826_v0 = vpop.permute.xlu1 %825 }
 0x450   : > { %v689_v20 = vpack.c.bf16 %v678_v59, %v678_v59  ;;  %v840_v1 = vmul.f32 %v826_v0, %v1420_v44  ;;  %v683_v44 = vld [vmem:[%s1583_s2 + $0x20] sm:$0xff] }
 0x451   : > { %v686_v12 = vpack.c.bf16 %v683_v44, %v683_v44 }
 0x452   : > { %v722_v63 = vsel %vm720_vm10, %v689_v20, 0  ;;  %877 = vperm.xlu1 %1192, %v840_v1  }
 0x453   : > { %1085 = vmatpush3.bf16.msra.mxu0 %v722_v63  ;;  %1109 = vmatpush3.bf16.msra.mxu1 %v722_v63  ;;  %v830_v5 = vpop.permute.xlu1 %829 }
 0x454   : > { %v842_v7 = vmul.f32 %v830_v5, %v1425_v45 }
 0x456   : > { %1087 = vmatmul.mubr.msk.bf16.vlgmr.msra.gmra.mrb[0].mxu0 %vm710_vm11, %v684_v3  ;;  %1091 = vmatmul.mubr.msk.bf16.vlgmr.msra.gmra.mrb[0].mxu1 %vm710_vm11, %v685_v4 }
 0x457   : > { %1094 = vmatprep.mubr.msk.bf16.mxu1 %vm1253_vm9, %v1251_v9  ;;  %892 = vperm.xlu1 %1192, %v843_v6   ;;  %v834_v10 = vpop.permute.xlu1 %833  ;;  %v935_v9 = vld [vmem:[%s1582_s1] sm:$0x1] }
 0x458   : > { %v844_v11 = vmul.f32 %v834_v10, %v1446_v51  ;;  %887 = vperm.xlu0 %1193, %v842_v7  }
 0x45b   : > { %897 = vperm.xlu1 %1192, %v844_v11   ;;  %v696_v15 = vpop.permute.xlu1 %695 }
 0x45c   : > { %1195 = vset.pattern.permute.xlu0 %v1256_v8 }
 0x45d   : > { %949 = vperm.xlu0 %1195, %v1437_v47   ;;  %v692_v47 = vpop.permute.xlu0 %691 }
 0x45e   : > { %1095 = vmatmul.mubr.msk.bf16.gmra.mrb[4].mxu1 %vm710_vm11, %v686_v12 }
 0x45f   : > { %1194 = vset.pattern.permute.xlu1 %v1256_v8  ;;  %v700_v14 = vpop.permute.xlu1 %699 }
 0x460   : > { %945 = vperm.xlu1 %1194, %v1425_v45  }
 0x461   : > { %1196 = vset.pattern.permute.xlu0 %v1258_v13  ;;  %v848_v19 = vpop.permute.xlu0 %847 }
 0x462   : > { %973 = vperm.xlu0 %1196, %v935_v9  }
 0x464   : > { %953 = vperm.xlu1 %1194, %v1446_v51   ;;  %v853_v17 = vpop.permute.xlu1 %852 }
 0x465   : > { %v858_v8 = vpop.permute.xlu0 %857 }
 0x469   : > { %v704_v49 = vpop.permute.xlu1 %703  ;;  %v911_v22 = vpop.permute.xlu0 %910 }
 0x46d   : > { %v708_v18 = vpop.permute.xlu1 %707  ;;  %v915_v24 = vpop.permute.xlu0 %914 }
 0x471   : > { %v919_v45 = vpop.permute.xlu0 %918 }
 0x472   : > { %v863_v16 = vpop.permute.xlu1 %862 }
 0x475   : > { %v942_v26 = vpop.permute.xlu0 %941 }
 0x477   : > { %v907_v21 = vpop.permute.xlu1 %906 }
 0x47c   : > { %v868_v23 = vpop.permute.xlu1 %867 }
 0x481   : > { %v938_v48 = vpop.permute.xlu1 %937 }
 0x486   : > { %v923_v25 = vpop.permute.xlu1 %922 }
 0x4c6   : > { %v883_v28 = vpop.permute.xlu0 %882 }
 0x4d1   : > { %v878_v27 = vpop.permute.xlu1 %877 }
 0x4d6   : > { %v893_v51 = vpop.permute.xlu1 %892 }
 0x4d7   : > { %v888_v29 = vpop.permute.xlu0 %887 }
 0x4da   : > { %v898_v59 = vpop.permute.xlu1 %897 }
 0x4dc   : > { %v950_v11 = vpop.permute.xlu0 %949 }
 0x4df   : > { %v946_v5 = vpop.permute.xlu1 %945 }
 0x529   : > { %v758_v30 = vpop.f32.mrb[0].mxu0  ;;  %v766_v31 = vpop.f32.mrb[0].mxu1 }
 0x52a   : > { %v759_v32 = vadd.f32 %v758_v30, %v692_v47  ;;  %v767_v33 = vadd.f32 %v766_v31, %v700_v14  ;;  %v1088_v34 = vpop.f32.mrb[1].mxu0  ;;  %v1092_v35 = vpop.f32.mrb[1].mxu1 }
 0x52b   : > { %v761_v36 = vpop.f32.mrb[2].mxu0  ;;  %v769_v37 = vpop.f32.mrb[2].mxu1 }
 0x52c   : > { %v870_v38 = vsub.f32 %v759_v32, %v848_v19  ;;  %v762_v39 = vadd.f32 %v761_v36, %v696_v15  ;;  %v770_v58 = vadd.f32 %v769_v37, %v704_v49  ;;  %v1089_v40 = vpop.f32.mrb[3].mxu0  ;;  %v1093_v41 = vpop.f32.mrb[3].mxu1  ;;  %v872_v42 = vsub.f32 %v767_v33, %v858_v8 }
 0x52d   : > { %v954_v49 = vpop.permute.xlu1 %953 }
 0x52e   : > { %v900_v43 = vmul.f32 %v878_v27, %v870_v38  ;;  %v871_v50 = vsub.f32 %v762_v39, %v853_v17  ;;  %v873_v52 = vsub.f32 %v770_v58, %v863_v16  ;;  %v902_v53 = vmul.f32 %v888_v29, %v872_v42 }
 0x530   : > { %v925_v54 = vadd.f32 %v907_v21, %v900_v43  ;;  %v901_v55 = vmul.f32 %v883_v28, %v871_v50  ;;  %v903_v56 = vmul.f32 %v893_v51, %v873_v52  ;;  %v927_v57 = vadd.f32 %v915_v24, %v902_v53  ;;  %v974_v24 = vpop.permute.xlu0 %973 }
 0x531   : > { %v774_v60 = vpop.f32.mrb[4].mxu1 }
 0x532   : > { %v930_v46 = vmax.f32 %v925_v54, 0.0  ;;  %v926_v61 = vadd.f32 %v911_v22, %v901_v55  ;;  %v775_v62 = vadd.f32 %v774_v60, %v708_v18  ;;  %v1096_v0 = vpop.f32.mrb[5].mxu1  ;;  %v928_v1 = vadd.f32 %v919_v45, %v903_v56 }
 0x533   : > { %v777_v20 = vpop.f32.mrb[6].mxu1  ;;  %v932_v3 = vmax.f32 %v927_v57, 0.0 }
 0x534   : > { %v931_v2 = vmax.f32 %v926_v61, 0.0  ;;  %v874_v63 = vsub.f32 %v775_v62, %v868_v23  ;;  %v1097_v4 = vpop.f32.mrb[7].mxu1  ;;  %v956_v7 = vmul.f32 %v938_v48, %v930_v46  ;;  %v933_v10 = vmax.f32 %v928_v1, 0.0 }
 0x535   : > { %v958_v12 = vmul.f32 %v946_v5, %v932_v3 }
 0x536   : > { %v904_v6 = vmul.f32 %v898_v59, %v874_v63  ;;  %v957_v44 = vmul.f32 %v942_v26, %v931_v2  ;;  %v959_v14 = vmul.f32 %v950_v11, %v933_v10 }
 0x538   : > { %v961_v9 = vadd.f32 %v957_v44, %v956_v7  ;;  %v929_v13 = vadd.f32 %v923_v25, %v904_v6 }
 0x53a   : > { %v962_v15 = vadd.f32 %v961_v9, %v958_v12  ;;  %v934_v17 = vmax.f32 %v929_v13, 0.0 }
 0x53c   : > { %v963_v47 = vadd.f32 %v962_v15, %v959_v14  ;;  %v960_v18 = vmul.f32 %v954_v49, %v934_v17 }
 0x53e   : > { %v964_v19 = vadd.f32 %v963_v47, %v960_v18 }
 0x540   : > { %v965_v16 = vrot.slane %v964_v19, 4 }
 0x542   : > { %v966_v8 = vadd.f32 %v965_v16, %v964_v19 }
 0x544   : > { %v967_v21 = vrot.slane %v966_v8, 2 }
 0x546   : > { %v968_v22 = vadd.f32 %v967_v21, %v966_v8 }
 0x548   : > { %v969_v23 = vrot.slane %v968_v22, 1 }
 0x54a   : > { %v970_v48 = vadd.f32 %v969_v23, %v968_v22 }
 0x54c   : > { %v976_v45 = vadd.f32 %v974_v24, %v970_v48 }
 0x54e   : > { %977 = vst [vmem:[%s1584_s3] sm:$0x1] %v976_v45 }
 0x54f PF: > { %s13_s14 = sadd.s32 1, %s1239_s14   ;;  %s1585_s12 = smov %s1235_s13 }
 0x550   : > { %p10_p8 = scmp.ge.s32.totalorder %s13_s14, 5   ;;  %s1586_s13 = smov %s1588_s15 }
 0x552   :  { %12 = sbr.rel (!%p10_p8) target bundleno = 2 (0x2), region = 78 }

</bundles_post_ra>
